<compile_context>
chip_gen: v7x
topology: tpu7x:2x2x1
jax: 0.10.0
libtpu: 0.0.40
codegen_flags: <defaults>
</compile_context>

<pallas_src>
import jax
import jax.numpy as jnp
from jax.experimental import pallas as pl
from jax.experimental.pallas import tpu as pltpu


def critic_kernel(state_ref, action_ref,
                  w14s_ref, w14a_ref, b14_ref,
                  w2_ref, b2_ref, w5_ref, b5_ref,
                  w36_ref, b36_ref,
                  q_ref):
    cdt = w2_ref.dtype                      # MXU operand dtype (f32 or bf16)
    xs = state_ref[...].astype(cdt)
    xa = action_ref[...].astype(cdt)

    # Fused layer 1 for both branches: sa @ [w1 | w4]  == xs @ W14_s + xa @ W14_a
    hg = (jnp.dot(xs, w14s_ref[...], preferred_element_type=jnp.float32)
          + jnp.dot(xa, w14a_ref[...], preferred_element_type=jnp.float32)
          + b14_ref[...])
    hg = jnp.maximum(hg, 0.0)               # (TB, 512), f32

    H = w2_ref.shape[0]                     # hidden = 256
    h = hg[:, :H]                           # Q1 branch activations
    g = hg[:, H:]                           # Q2 branch activations

    # Layer 2 of each branch (two 256x256 MXU matmuls, f32 accumulation).
    h = jnp.maximum(
        jnp.dot(h.astype(cdt), w2_ref[...], preferred_element_type=jnp.float32)
        + b2_ref[...], 0.0)
    g = jnp.maximum(
        jnp.dot(g.astype(cdt), w5_ref[...], preferred_element_type=jnp.float32)
        + b5_ref[...], 0.0)

    # Output layer: N=1 matmuls replaced by VPU multiply + lane (XLU) reduction.
    q1 = jnp.sum(h * w36_ref[0:1, :], axis=-1, keepdims=True) + b36_ref[:, 0:1]
    q2 = jnp.sum(g * w36_ref[1:2, :], axis=-1, keepdims=True) + b36_ref[:, 1:2]

    q_ref[:, 0:1] = q1.astype(q_ref.dtype)
    q_ref[:, 1:2] = q2.astype(q_ref.dtype)


def pack_params(p, state_dim, use_bf16=False):
    """Repack the 6 Linear layers into the fused layout the kernel expects."""
    wdt = jnp.bfloat16 if use_bf16 else jnp.float32
    w14 = jnp.concatenate([p["w1"], p["w4"]], axis=1)          # (D, 512)
    return dict(
        w14_s=w14[:state_dim].astype(wdt),                     # (state_dim, 512)
        w14_a=w14[state_dim:].astype(wdt),                     # (action_dim, 512)
        b14=jnp.concatenate([p["b1"], p["b4"]], axis=1),       # (1, 512)  f32
        w2=p["w2"].astype(wdt), b2=p["b2"],                    # (256,256), (1,256)
        w5=p["w5"].astype(wdt), b5=p["b5"],                    # (256,256), (1,256)
        w36=jnp.concatenate([p["w3"].T, p["w6"].T], axis=0),   # (2, 256)  f32
        b36=jnp.concatenate([p["b3"], p["b6"]], axis=1),       # (1, 2)    f32
    )


def critic_forward(state, action, params, *, use_bf16=False, block_b=128):
    """Runs Critic.forward. Returns (q1, q2), each (B, 1) float32."""
    B, state_dim = state.shape
    action_dim = action.shape[1]
    pk = pack_params(params, state_dim, use_bf16=use_bf16)

    # Batch tile: 128 rows when the batch is large, otherwise round B up to a
    # sublane multiple (8). Padded rows compute garbage that is sliced off below.
    TB = block_b if B >= block_b else ((B + 7) // 8) * 8
    n_tiles = pl.cdiv(B, TB)
    B_pad = n_tiles * TB
    if B_pad != B:
        pad = B_pad - B
        state = jnp.pad(state, ((0, pad), (0, 0)))
        action = jnp.pad(action, ((0, pad), (0, 0)))

    def row_spec(d):
        return pl.BlockSpec((TB, d), lambda i: (i, 0))

    def const_spec(shape):
        # Full array, same block every grid step -> stays VMEM-resident.
        return pl.BlockSpec(shape, lambda i: (0, 0))

    q = pl.pallas_call(
        critic_kernel,
        out_shape=jax.ShapeDtypeStruct((B_pad, 2), jnp.float32),
        grid=(n_tiles,),
        in_specs=[
            row_spec(state_dim),
            row_spec(action_dim),
            const_spec(pk["w14_s"].shape),
            const_spec(pk["w14_a"].shape),
            const_spec(pk["b14"].shape),
            const_spec(pk["w2"].shape),
            const_spec(pk["b2"].shape),
            const_spec(pk["w5"].shape),
            const_spec(pk["b5"].shape),
            const_spec(pk["w36"].shape),
            const_spec(pk["b36"].shape),
        ],
        out_specs=pl.BlockSpec((TB, 2), lambda i: (i, 0)),
        compiler_params=pltpu.CompilerParams(
            dimension_semantics=("parallel",)),
    )(state, action,
      pk["w14_s"], pk["w14_a"], pk["b14"],
      pk["w2"], pk["b2"], pk["w5"], pk["b5"],
      pk["w36"], pk["b36"])

    q = q[:B]
    return q[:, 0:1], q[:, 1:2]


def init_params(key, state_dim, action_dim, hidden=256):
    """Deterministic synthetic parameters (PyTorch Linear shapes, stored (in, out))."""
    d = state_dim + action_dim
    shapes = {
        "w1": (d, hidden),      "b1": (1, hidden),
        "w2": (hidden, hidden), "b2": (1, hidden),
        "w3": (hidden, 1),      "b3": (1, 1),
        "w4": (d, hidden),      "b4": (1, hidden),
        "w5": (hidden, hidden), "b5": (1, hidden),
        "w6": (hidden, 1),      "b6": (1, 1),
    }
    params = {}
    keys = jax.random.split(key, len(shapes))
    for k, (name, shp) in zip(keys, sorted(shapes.items())):
        fan_in = shp[0] if name.startswith("w") else shapes["w" + name[1:]][0]
        bound = 1.0 / jnp.sqrt(jnp.float32(fan_in))
        params[name] = jax.random.uniform(k, shp, jnp.float32, -bound, bound)
    return params


def reference_forward(state, action, p):
    """Pure-JAX reference for correctness checking."""
    sa = jnp.concatenate([state, action], axis=1)
    h = jax.nn.relu(sa @ p["w1"] + p["b1"])
    h = jax.nn.relu(h @ p["w2"] + p["b2"])
    q1 = h @ p["w3"] + p["b3"]
    g = jax.nn.relu(sa @ p["w4"] + p["b4"])
    g = jax.nn.relu(g @ p["w5"] + p["b5"])
    q2 = g @ p["w6"] + p["b6"]
    return q1, q2


if __name__ == "__main__":
    state_dim, action_dim = 12, 4
    key = jax.random.PRNGKey(0)
    k_s, k_a, k_p, k_s2, k_a2 = jax.random.split(key, 5)
    params = init_params(k_p, state_dim, action_dim)

    # Small batch (single tile, TB rounded to 8).
    B = 8
    state = jax.random.normal(k_s, (B, state_dim), jnp.float32)
    action = jax.random.normal(k_a, (B, action_dim), jnp.float32)
    q1, q2 = critic_forward(state, action, params)
    jax.block_until_ready((q1, q2))
    r1, r2 = reference_forward(state, action, params)
    assert q1.shape == (B, 1) and q2.shape == (B, 1)
    assert jnp.allclose(q1, r1, atol=1e-4, rtol=1e-4)
    assert jnp.allclose(q2, r2, atol=1e-4, rtol=1e-4)

    # Larger, non-tile-multiple batch exercising the parallel grid + padding path.
    B2 = 200
    state2 = jax.random.normal(k_s2, (B2, state_dim), jnp.float32)
    action2 = jax.random.normal(k_a2, (B2, action_dim), jnp.float32)
    q1b, q2b = critic_forward(state2, action2, params)
    jax.block_until_ready((q1b, q2b))
    r1b, r2b = reference_forward(state2, action2, params)
    assert q1b.shape == (B2, 1) and q2b.shape == (B2, 1)
    assert jnp.allclose(q1b, r1b, atol=1e-4, rtol=1e-4)
    assert jnp.allclose(q2b, r2b, atol=1e-4, rtol=1e-4)

    print("KERNEL_OK")
</pallas_src>

<mosaic_0001>
module attributes {stable_mosaic.version = 11 : i64} {
  func.func @critic_kernel(%arg0: i32, %arg1: memref<8x12xf32, #tpu.memory_space<vmem>>, %arg2: memref<8x4xf32, #tpu.memory_space<vmem>>, %arg3: memref<12x512xf32, #tpu.memory_space<vmem>>, %arg4: memref<4x512xf32, #tpu.memory_space<vmem>>, %arg5: memref<1x512xf32, #tpu.memory_space<vmem>>, %arg6: memref<256x256xf32, #tpu.memory_space<vmem>>, %arg7: memref<1x256xf32, #tpu.memory_space<vmem>>, %arg8: memref<256x256xf32, #tpu.memory_space<vmem>>, %arg9: memref<1x256xf32, #tpu.memory_space<vmem>>, %arg10: memref<2x256xf32, #tpu.memory_space<vmem>>, %arg11: memref<1x2xf32, #tpu.memory_space<vmem>>, %arg12: memref<8x2xf32, #tpu.memory_space<vmem>>) attributes {dimension_semantics = [#tpu.dimension_semantics<parallel>], iteration_bounds = array<i64: 1>, scalar_prefetch = 0 : i64, scratch_operands = 0 : i64, tpu.core_type = #tpu.core_type<tc>, window_params = [{transform_indices = @transform_0, window_bounds = array<i64: 8, 12>}, {transform_indices = @transform_1, window_bounds = array<i64: 8, 4>}, {pipeline_mode = #tpu.pipeline_mode<synchronous>, transform_indices = @transform_2, window_bounds = array<i64: 12, 512>}, {pipeline_mode = #tpu.pipeline_mode<synchronous>, transform_indices = @transform_3, window_bounds = array<i64: 4, 512>}, {pipeline_mode = #tpu.pipeline_mode<synchronous>, transform_indices = @transform_4, window_bounds = array<i64: 1, 512>}, {pipeline_mode = #tpu.pipeline_mode<synchronous>, transform_indices = @transform_5, window_bounds = array<i64: 256, 256>}, {pipeline_mode = #tpu.pipeline_mode<synchronous>, transform_indices = @transform_6, window_bounds = array<i64: 1, 256>}, {pipeline_mode = #tpu.pipeline_mode<synchronous>, transform_indices = @transform_7, window_bounds = array<i64: 256, 256>}, {pipeline_mode = #tpu.pipeline_mode<synchronous>, transform_indices = @transform_8, window_bounds = array<i64: 1, 256>}, {pipeline_mode = #tpu.pipeline_mode<synchronous>, transform_indices = @transform_9, window_bounds = array<i64: 2, 256>}, {pipeline_mode = #tpu.pipeline_mode<synchronous>, transform_indices = @transform_10, window_bounds = array<i64: 1, 2>}, {transform_indices = @transform_11, window_bounds = array<i64: 8, 2>}]} {
    %c0 = arith.constant 0 : index
    %c0_0 = arith.constant 0 : index
    %0 = vector.load %arg1[%c0, %c0_0] : memref<8x12xf32, #tpu.memory_space<vmem>>, vector<8x12xf32>
    %c0_1 = arith.constant 0 : index
    %c0_2 = arith.constant 0 : index
    %1 = vector.load %arg2[%c0_1, %c0_2] : memref<8x4xf32, #tpu.memory_space<vmem>>, vector<8x4xf32>
    %c0_3 = arith.constant 0 : index
    %c0_4 = arith.constant 0 : index
    %2 = vector.load %arg3[%c0_3, %c0_4] : memref<12x512xf32, #tpu.memory_space<vmem>>, vector<12x512xf32>
    %cst = arith.constant dense<0.000000e+00> : vector<8x512xf32>
    %3 = tpu.matmul %0, %2, %cst {dimension_numbers = #tpu.dot_dimension_numbers<[1], [0], [0], [1], [0, 0, 1, 1], [], []>} : vector<8x12xf32>, vector<12x512xf32>, vector<8x512xf32> -> vector<8x512xf32>
    %c0_5 = arith.constant 0 : index
    %c0_6 = arith.constant 0 : index
    %4 = vector.load %arg4[%c0_5, %c0_6] : memref<4x512xf32, #tpu.memory_space<vmem>>, vector<4x512xf32>
    %cst_7 = arith.constant dense<0.000000e+00> : vector<8x512xf32>
    %5 = tpu.matmul %1, %4, %cst_7 {dimension_numbers = #tpu.dot_dimension_numbers<[1], [0], [0], [1], [0, 0, 1, 1], [], []>} : vector<8x4xf32>, vector<4x512xf32>, vector<8x512xf32> -> vector<8x512xf32>
    %6 = arith.addf %3, %5 : vector<8x512xf32>
    %c0_8 = arith.constant 0 : index
    %c0_9 = arith.constant 0 : index
    %7 = vector.load %arg5[%c0_8, %c0_9] : memref<1x512xf32, #tpu.memory_space<vmem>>, vector<1x512xf32>
    %8 = vector.broadcast %7 : vector<1x512xf32> to vector<8x512xf32>
    %9 = arith.addf %6, %8 : vector<8x512xf32>
    %cst_10 = arith.constant 0.000000e+00 : f32
    %10 = vector.broadcast %cst_10 : f32 to vector<8x512xf32>
    %11 = arith.maximumf %9, %10 : vector<8x512xf32>
    %12 = vector.extract_strided_slice %11 {offsets = [0, 0], sizes = [8, 256], strides = [1, 1]} : vector<8x512xf32> to vector<8x256xf32>
    %13 = vector.extract_strided_slice %11 {offsets = [0, 256], sizes = [8, 256], strides = [1, 1]} : vector<8x512xf32> to vector<8x256xf32>
    %c0_11 = arith.constant 0 : index
    %c0_12 = arith.constant 0 : index
    %14 = vector.load %arg6[%c0_11, %c0_12] : memref<256x256xf32, #tpu.memory_space<vmem>>, vector<256x256xf32>
    %cst_13 = arith.constant dense<0.000000e+00> : vector<8x256xf32>
    %15 = tpu.matmul %12, %14, %cst_13 {dimension_numbers = #tpu.dot_dimension_numbers<[1], [0], [0], [1], [0, 0, 1, 1], [], []>} : vector<8x256xf32>, vector<256x256xf32>, vector<8x256xf32> -> vector<8x256xf32>
    %c0_14 = arith.constant 0 : index
    %c0_15 = arith.constant 0 : index
    %16 = vector.load %arg7[%c0_14, %c0_15] : memref<1x256xf32, #tpu.memory_space<vmem>>, vector<1x256xf32>
    %17 = vector.broadcast %16 : vector<1x256xf32> to vector<8x256xf32>
    %18 = arith.addf %15, %17 : vector<8x256xf32>
    %cst_16 = arith.constant 0.000000e+00 : f32
    %19 = vector.broadcast %cst_16 : f32 to vector<8x256xf32>
    %20 = arith.maximumf %18, %19 : vector<8x256xf32>
    %c0_17 = arith.constant 0 : index
    %c0_18 = arith.constant 0 : index
    %21 = vector.load %arg8[%c0_17, %c0_18] : memref<256x256xf32, #tpu.memory_space<vmem>>, vector<256x256xf32>
    %cst_19 = arith.constant dense<0.000000e+00> : vector<8x256xf32>
    %22 = tpu.matmul %13, %21, %cst_19 {dimension_numbers = #tpu.dot_dimension_numbers<[1], [0], [0], [1], [0, 0, 1, 1], [], []>} : vector<8x256xf32>, vector<256x256xf32>, vector<8x256xf32> -> vector<8x256xf32>
    %c0_20 = arith.constant 0 : index
    %c0_21 = arith.constant 0 : index
    %23 = vector.load %arg9[%c0_20, %c0_21] : memref<1x256xf32, #tpu.memory_space<vmem>>, vector<1x256xf32>
    %24 = vector.broadcast %23 : vector<1x256xf32> to vector<8x256xf32>
    %25 = arith.addf %22, %24 : vector<8x256xf32>
    %cst_22 = arith.constant 0.000000e+00 : f32
    %26 = vector.broadcast %cst_22 : f32 to vector<8x256xf32>
    %27 = arith.maximumf %25, %26 : vector<8x256xf32>
    %c0_23 = arith.constant 0 : index
    %c0_24 = arith.constant 0 : index
    %28 = vector.load %arg10[%c0_23, %c0_24] : memref<2x256xf32, #tpu.memory_space<vmem>>, vector<1x256xf32>
    %29 = vector.broadcast %28 : vector<1x256xf32> to vector<8x256xf32>
    %30 = arith.mulf %20, %29 : vector<8x256xf32>
    %cst_25 = arith.constant dense<0.000000e+00> : vector<8xf32>
    %31 = vector.multi_reduction <add>, %30, %cst_25 [1] : vector<8x256xf32> to vector<8xf32>
    %32 = vector.shape_cast %31 : vector<8xf32> to vector<8x1xf32>
    %c0_26 = arith.constant 0 : index
    %c0_27 = arith.constant 0 : index
    %33 = vector.load %arg11[%c0_26, %c0_27] : memref<1x2xf32, #tpu.memory_space<vmem>>, vector<1x1xf32>
    %34 = vector.broadcast %33 : vector<1x1xf32> to vector<8x1xf32>
    %35 = arith.addf %32, %34 : vector<8x1xf32>
    %c1 = arith.constant 1 : index
    %c0_28 = arith.constant 0 : index
    %36 = vector.load %arg10[%c1, %c0_28] : memref<2x256xf32, #tpu.memory_space<vmem>>, vector<1x256xf32>
    %37 = vector.broadcast %36 : vector<1x256xf32> to vector<8x256xf32>
    %38 = arith.mulf %27, %37 : vector<8x256xf32>
    %cst_29 = arith.constant dense<0.000000e+00> : vector<8xf32>
    %39 = vector.multi_reduction <add>, %38, %cst_29 [1] : vector<8x256xf32> to vector<8xf32>
    %40 = vector.shape_cast %39 : vector<8xf32> to vector<8x1xf32>
    %c0_30 = arith.constant 0 : index
    %c1_31 = arith.constant 1 : index
    %41 = vector.load %arg11[%c0_30, %c1_31] : memref<1x2xf32, #tpu.memory_space<vmem>>, vector<1x1xf32>
    %42 = vector.broadcast %41 : vector<1x1xf32> to vector<8x1xf32>
    %43 = arith.addf %40, %42 : vector<8x1xf32>
    %c0_32 = arith.constant 0 : index
    %c0_33 = arith.constant 0 : index
    %44 = vector.load %arg12[%c0_32, %c0_33] : memref<8x2xf32, #tpu.memory_space<vmem>>, vector<8x1xf32>
    tpu.vector_store %arg12[%c0_32, %c0_33], %35 {strides = array<i32>} : memref<8x2xf32, #tpu.memory_space<vmem>>, vector<8x1xf32>,
    %c0_34 = arith.constant 0 : index
    %c1_35 = arith.constant 1 : index
    %45 = vector.load %arg12[%c0_34, %c1_35] : memref<8x2xf32, #tpu.memory_space<vmem>>, vector<8x1xf32>
    tpu.vector_store %arg12[%c0_34, %c1_35], %43 {strides = array<i32>} : memref<8x2xf32, #tpu.memory_space<vmem>>, vector<8x1xf32>,
    return
  }
  func.func @transform_0(%arg0: i32) -> (i32, i32) {
    %c0_i32 = arith.constant 0 : i32
    %c0_i32_0 = arith.constant 0 : i32
    return %arg0, %c0_i32 : i32, i32
  }
  func.func @transform_1(%arg0: i32) -> (i32, i32) {
    %c0_i32 = arith.constant 0 : i32
    %c0_i32_0 = arith.constant 0 : i32
    return %arg0, %c0_i32 : i32, i32
  }
  func.func @transform_2(%arg0: i32) -> (i32, i32) {
    %c0_i32 = arith.constant 0 : i32
    %c0_i32_0 = arith.constant 0 : i32
    %c0_i32_1 = arith.constant 0 : i32
    return %c0_i32, %c0_i32_0 : i32, i32
  }
  func.func @transform_3(%arg0: i32) -> (i32, i32) {
    %c0_i32 = arith.constant 0 : i32
    %c0_i32_0 = arith.constant 0 : i32
    %c0_i32_1 = arith.constant 0 : i32
    return %c0_i32, %c0_i32_0 : i32, i32
  }
  func.func @transform_4(%arg0: i32) -> (i32, i32) {
    %c0_i32 = arith.constant 0 : i32
    %c0_i32_0 = arith.constant 0 : i32
    %c0_i32_1 = arith.constant 0 : i32
    return %c0_i32, %c0_i32_0 : i32, i32
  }
  func.func @transform_5(%arg0: i32) -> (i32, i32) {
    %c0_i32 = arith.constant 0 : i32
    %c0_i32_0 = arith.constant 0 : i32
    %c0_i32_1 = arith.constant 0 : i32
    return %c0_i32, %c0_i32_0 : i32, i32
  }
  func.func @transform_6(%arg0: i32) -> (i32, i32) {
    %c0_i32 = arith.constant 0 : i32
    %c0_i32_0 = arith.constant 0 : i32
    %c0_i32_1 = arith.constant 0 : i32
    return %c0_i32, %c0_i32_0 : i32, i32
  }
  func.func @transform_7(%arg0: i32) -> (i32, i32) {
    %c0_i32 = arith.constant 0 : i32
    %c0_i32_0 = arith.constant 0 : i32
    %c0_i32_1 = arith.constant 0 : i32
    return %c0_i32, %c0_i32_0 : i32, i32
  }
  func.func @transform_8(%arg0: i32) -> (i32, i32) {
    %c0_i32 = arith.constant 0 : i32
    %c0_i32_0 = arith.constant 0 : i32
    %c0_i32_1 = arith.constant 0 : i32
    return %c0_i32, %c0_i32_0 : i32, i32
  }
  func.func @transform_9(%arg0: i32) -> (i32, i32) {
    %c0_i32 = arith.constant 0 : i32
    %c0_i32_0 = arith.constant 0 : i32
    %c0_i32_1 = arith.constant 0 : i32
    return %c0_i32, %c0_i32_0 : i32, i32
  }
  func.func @transform_10(%arg0: i32) -> (i32, i32) {
    %c0_i32 = arith.constant 0 : i32
    %c0_i32_0 = arith.constant 0 : i32
    %c0_i32_1 = arith.constant 0 : i32
    return %c0_i32, %c0_i32_0 : i32, i32
  }
  func.func @transform_11(%arg0: i32) -> (i32, i32) {
    %c0_i32 = arith.constant 0 : i32
    %c0_i32_0 = arith.constant 0 : i32
    return %arg0, %c0_i32 : i32, i32
  }
}

</mosaic_0001>

<bundles_post_ra>
// kernel: tpu_custom_call.1
= control target key start
LH: loop header
LB: loop body
LE: loop exit
PB: predicated region body
PF: predicated region fallthrough
CT: control target
= control target key end

     0   :  { %16 = vsyncpa [#allocation3], 0  ;;  %s1237_s0 = inlined_call_operand.hbm [shape: f32[8,12], index: 0, kind: input, shape index: {}]   ;;  %s1238_s1 = inlined_call_operand.vmem [shape: f32[8,4], index: 1, kind: input, shape index: {}]   ;;  %s1239_s2 = inlined_call_operand.hbm [shape: f32[12,512], index: 2, kind: input, shape index: {}]   ;;  %s1240_s3 = inlined_call_operand.vmem [shape: f32[4,512], index: 3, kind: input, shape index: {}]   ;;  %s1241_s4 = inlined_call_operand.vmem [shape: f32[1,512], index: 4, kind: input, shape index: {}]   ;;  %s1242_s5 = inlined_call_operand.hbm [shape: f32[256,256], index: 5, kind: input, shape index: {}]   ;;  %s1243_s6 = inlined_call_operand.vmem [shape: f32[1,256], index: 6, kind: input, shape index: {}]   ;;  %s1244_s7 = inlined_call_operand.hbm [shape: f32[256,256], index: 7, kind: input, shape index: {}]   ;;  %s1245_s8 = inlined_call_operand.vmem [shape: f32[1,256], index: 8, kind: input, shape index: {}]   ;;  %s1246_s9 = inlined_call_operand.vmem [shape: f32[2,256], index: 9, kind: input, shape index: {}]   ;;  %s1247_s10 = inlined_call_operand.vmem [shape: f32[1,2], index: 10, kind: input, shape index: {}]   ;;  %s1248_s11 = inlined_call_operand.vmem [shape: f32[8,2], index: 11, kind: output, shape index: {}]  }
   0x1   :  { %17 = vsyncpa [#allocation5], 0 }
   0x2   :  { %18 = vsyncpa [#allocation8], 0  ;;  %s1067_s17 = smov [#allocation4]   ;;  %s973_s21 = scalar_lea.hbm %s1239_s2, 1024 }
   0x3   :  { %s36_s18 = sshll.u32 %s1067_s17, 4  ;;  %p974_p0 = scmp.ne.s32.totalorder %s1239_s2, %s973_s21  ;;  %s37_s18 = int_to_ptr.vmem [resolvable:$true] %s36_s18 }
   0x4   :  { %p977_p1 = scmp.lt.u32.totalorder %s973_s21, %s1239_s2 }
   0x6   :  { %p979_p2 = pnand %p977_p1, %p974_p0 }
   0x8   :  { %982 = shalt.err (!%p979_p2)
}
   0x9   :  { %s983_s26 = scalar_lea.vmem %s37_s18, 1024  ;;  %p988_p4 = scmp.lt.s32.totalorder %s37_s18, %s37_s18 }
   0xa   :  { %p984_p3 = scmp.ne.s32.totalorder %s37_s18, %s983_s26  ;;  %p989_p5 = scmp.lt.s32.totalorder %s983_s26, %s983_s26 }
   0xc   :  { %p990_p6 = por %p989_p5, %p988_p4 }
   0xe   :  { %p991_p7 = pnand %p990_p6, %p984_p3 }
  0x10   :  { %994 = shalt.err (!%p991_p7)
}
  0x11   :  { %s1068_s27 = smov 512   ;;  %s1069_s28 = smov 32  }
  0x12   :  { %42 = dma.hbm_to_vmem [thread:$0]  %s1239_s2, 1024, %s37_s18, [#allocation5], %s1068_s27, %s1068_s27, %s1069_s28  }
  0x13   :  { %s1070_s12 = smov [#allocation2]   ;;  %s1071_s14 = smov [#allocation6]  }
  0x14   :  { %s25_s13 = sshll.u32 %s1070_s12, 4  ;;  %s52_s15 = sshll.u32 %s1071_s14, 4  ;;  %s26_s13 = int_to_ptr.vmem [resolvable:$true] %s25_s13  ;;  %s53_s15 = int_to_ptr.vmem [resolvable:$true] %s52_s15 }
  0x15   :  { %s995_s19 = scalar_lea.hbm %s1237_s0, 128 }
  0x16   :  { %p996_p8 = scmp.ne.s32.totalorder %s1237_s0, %s995_s19  ;;  %p999_p9 = scmp.lt.u32.totalorder %s995_s19, %s1237_s0 }
  0x18   :  { %p1001_p10 = pnand %p999_p9, %p996_p8 }
  0x1a   :  { %1004 = shalt.err (!%p1001_p10)
}
  0x1b   :  { %s1005_s2 = scalar_lea.vmem %s26_s13, 128  ;;  %p1010_p12 = scmp.lt.s32.totalorder %s26_s13, %s26_s13 }
  0x1c   :  { %p1006_p11 = scmp.ne.s32.totalorder %s26_s13, %s1005_s2  ;;  %p1011_p13 = scmp.lt.s32.totalorder %s1005_s2, %s1005_s2 }
  0x1e   :  { %p1012_p0 = por %p1011_p13, %p1010_p12 }
  0x20   :  { %p1013_p1 = pnand %p1012_p0, %p1006_p11 }
  0x22   :  { %1016 = shalt.err (!%p1013_p1)
}
  0x23   :  { %28 = dma.hbm_to_vmem [thread:$0]  %s1237_s0, 128, %s26_s13, [#allocation3]  }
  0x24   :  { %s1017_s27 = scalar_lea.hbm %s1242_s5, 8192 }
  0x25   :  { %p1018_p2 = scmp.ne.s32.totalorder %s1242_s5, %s1017_s27  ;;  %p1021_p3 = scmp.lt.u32.totalorder %s1017_s27, %s1242_s5 }
  0x27   :  { %p1023_p4 = pnand %p1021_p3, %p1018_p2 }
  0x29   :  { %1026 = shalt.err (!%p1023_p4)
}
  0x2a   :  { %s1027_s14 = scalar_lea.vmem %s53_s15, 8192  ;;  %p1032_p6 = scmp.lt.s32.totalorder %s53_s15, %s53_s15 }
  0x2b   :  { %p1028_p5 = scmp.ne.s32.totalorder %s53_s15, %s1027_s14  ;;  %p1033_p7 = scmp.lt.s32.totalorder %s1027_s14, %s1027_s14 }
  0x2d   :  { %p1034_p8 = por %p1033_p7, %p1032_p6 }
  0x2f   :  { %p1035_p9 = pnand %p1034_p8, %p1028_p5 }
  0x31   :  { %1038 = shalt.err (!%p1035_p9)
}
  0x32   :  { %s1072_s0 = smov 256   ;;  %s1073_s13 = smov 16  }
  0x33   :  { %58 = dma.hbm_to_vmem [thread:$0]  %s1242_s5, 8192, %s53_s15, [#allocation5], %s1072_s0, %s1072_s0, %s1073_s13  }
  0x34   :  { %s1074_s19 = smov [#allocation7]   ;;  %s1039_s23 = scalar_lea.hbm %s1244_s7, 8192 }
  0x35   :  { %s66_s20 = sshll.u32 %s1074_s19, 4  ;;  %p1040_p10 = scmp.ne.s32.totalorder %s1244_s7, %s1039_s23  ;;  %s67_s20 = int_to_ptr.vmem [resolvable:$true] %s66_s20 }
  0x36   :  { %p1043_p11 = scmp.lt.u32.totalorder %s1039_s23, %s1244_s7 }
  0x38   :  { %p1045_p12 = pnand %p1043_p11, %p1040_p10 }
  0x3a   :  { %1048 = shalt.err (!%p1045_p12)
}
  0x3b   :  { %s1049_s26 = scalar_lea.vmem %s67_s20, 8192  ;;  %p1054_p0 = scmp.lt.s32.totalorder %s67_s20, %s67_s20 }
  0x3c   :  { %p1050_p13 = scmp.ne.s32.totalorder %s67_s20, %s1049_s26  ;;  %p1055_p1 = scmp.lt.s32.totalorder %s1049_s26, %s1049_s26 }
  0x3e   :  { %p1056_p2 = por %p1055_p1, %p1054_p0 }
  0x40   :  { %p1057_p3 = pnand %p1056_p2, %p1050_p13 }
  0x42   :  { %1060 = shalt.err (!%p1057_p3)
}
  0x43   :  { %72 = dma.hbm_to_vmem [thread:$0]  %s1244_s7, 8192, %s67_s20, [#allocation8], %s1072_s0, %s1072_s0, %s1073_s13  }
  0x44   :  { %1061 = dma.done.wait [#allocation3], 128  }
  0x45   :  { %1062 = vsyncadd [#allocation3], 4294967168 }
  0x46   :  { %1063 = dma.done.wait [#allocation5], 9216  }
  0x47   :  { %1064 = vsyncadd [#allocation5], 4294958080 }
  0x48   :  { %1065 = dma.done.wait [#allocation8], 8192  }
  0x49   :  { %1066 = vsyncadd [#allocation8], 4294959104  ;;  %v1075_v0 = vmov 0.0   ;;  %v101_v1 = vld [vmem:[%s1240_s3] sm:$0xff]  ;;  %vm111_vm0 = vcmask 1043456   ;;  %v102_v2 = vld [vmem:[%s1240_s3 + $0x8] sm:$0xff] }
  0x4a   :  { %184 = vmatprep.mubr.f32.mxu0 %v1075_v0  ;;  %255 = vmatprep.mubr.f32.mxu1 %v1075_v0  ;;  %v92_v3 = vld [vmem:[%s1238_s1] sm:$0xff]  ;;  %v105_v4 = vcombine.high %v101_v1, %v101_v1  ;;  %v106_v5 = vcombine.high %v102_v2, %v102_v2  ;;  %v94_v6 = vld [vmem:[#allocation4 + $0x8] sm:$0xff]  ;;  %v93_v8 = vld [vmem:[#allocation4] sm:$0xff]  ;;  %vm107_vm1 = vcmask 31744   ;;  %vm1076_vm2 = vmmov 1  }
  0x4b   :  { %v98_v7 = vld [vmem:[#allocation4 + $0x28] sm:$0xf]  ;;  %v97_v10 = vld [vmem:[#allocation4 + $0x20] sm:$0xf]  ;;  %v96_v11 = vld [vmem:[#allocation4 + $0x18] sm:$0xff]  ;;  %vm262_vm4 = vcmask 97280  }
  0x4c   :  { %v817_v9 = vpack.c.bf16 %v98_v7, %v94_v6  ;;  %v100_v12 = vld [vmem:[#allocation4 + $0x38] sm:$0xf]  ;;  %803 = vmatprep.subr.msk.mxu0 %vm111_vm0, %v105_v4  ;;  %806 = vmatprep.subr.msk.mxu1 %vm111_vm0, %v106_v5  ;;  %vm1197_vm3 = vmpackc.low %vm111_vm0, %vm1076_vm2  ;;  %v820_v14 = vpack.c.bf16 %v97_v10, %v93_v8  ;;  %v95_v16 = vld [vmem:[#allocation4 + $0x10] sm:$0xff]  ;;  %vm792_vm5 = vcmask 7168   ;;  %vm794_vm6 = vcmask 15368  }
  0x4d   :  { %v823_v15 = vpack.c.bf16 %v100_v12, %v96_v11  ;;  %v99_v17 = vld [vmem:[#allocation4 + $0x30] sm:$0xf]  ;;  %804 = vmatpush1.msk.msra.mxu0 %vm111_vm0, %v101_v1  ;;  %807 = vmatpush1.msk.msra.mxu1 %vm111_vm0, %v102_v2  ;;  %v451_v19 = vld [vmem:[#allocation6 + $0x8] sm:$0xff]  ;;  %v453_v20 = vld [vmem:[#allocation6 + $0x18] sm:$0xff] }
  0x4e   :  { %v826_v18 = vpack.c.bf16 %v99_v17, %v95_v16  ;;  %v600_v21 = vld [vmem:[#allocation7 + $0x8] sm:$0xff]  ;;  %805 = vmatmul.mubr.msk.f32.vlgmr.msra.gmra.mrb[0].mxu0 %vm107_vm1, %v92_v3  ;;  %808 = vmatmul.mubr.msk.f32.vlgmr.msra.gmra.mrb[0].mxu1 %vm107_vm1, %v92_v3  ;;  %v829_v22 = vpack.c.bf16 %v453_v20, %v451_v19  ;;  %v602_v23 = vld [vmem:[#allocation7 + $0x18] sm:$0xff]  ;;  %v450_v25 = vld [vmem:[#allocation6] sm:$0xff] }
  0x4f   :  { %819 = vmatprep.subr.msk.bf16.mxu0 %vm1197_vm3, %v817_v9  ;;  %825 = vmatprep.subr.msk.bf16.mxu1 %vm1197_vm3, %v823_v15  ;;  %v893_v24 = vpack.c.bf16 %v602_v23, %v600_v21  ;;  %v452_v26 = vld [vmem:[#allocation6 + $0x10] sm:$0xff]  ;;  %v599_v27 = vld [vmem:[#allocation7] sm:$0xff]  ;;  %v455_v29 = vld [vmem:[#allocation6 + $0x28] sm:$0xff] }
  0x50   :  { %822 = vmatpush1.bf16.msk.msra.mxu0 %vm1197_vm3, %v820_v14  ;;  %828 = vmatpush1.bf16.msk.msra.mxu1 %vm1197_vm3, %v826_v18  ;;  %v601_v28 = vld [vmem:[#allocation7 + $0x10] sm:$0xff]  ;;  %v457_v30 = vld [vmem:[#allocation6 + $0x38] sm:$0xff]  ;;  %v604_v31 = vld [vmem:[#allocation7 + $0x28] sm:$0xff]  ;;  %v831_v34 = vpack.c.bf16 %v452_v26, %v450_v25 }
  0x51   :  { %342 = vmatprep.mubr.f32.mxu0 %v1075_v0  ;;  %413 = vmatprep.mubr.f32.mxu1 %v1075_v0  ;;  %v606_v32 = vld [vmem:[#allocation7 + $0x38] sm:$0xff]  ;;  %v895_v35 = vpack.c.bf16 %v601_v28, %v599_v27  ;;  %v454_v36 = vld [vmem:[#allocation6 + $0x20] sm:$0xff]  ;;  %v456_v37 = vld [vmem:[#allocation6 + $0x30] sm:$0xff]  ;;  %v833_v38 = vpack.c.bf16 %v457_v30, %v455_v29 }
  0x52   :  { %830 = vmatprep.subr.bf16.mxu0 %v829_v22  ;;  %894 = vmatprep.subr.bf16.mxu1 %v893_v24  ;;  %v91_v33 = vld [vmem:[#allocation2] sm:$0xff]  ;;  %v897_v39 = vpack.c.bf16 %v606_v32, %v604_v31  ;;  %v603_v40 = vld [vmem:[#allocation7 + $0x20] sm:$0xff]  ;;  %v605_v41 = vld [vmem:[#allocation7 + $0x30] sm:$0xff]  ;;  %v835_v46 = vpack.c.bf16 %v456_v37, %v454_v36 }
  0x53   :  { %v459_v42 = vld [vmem:[#allocation6 + $0x48] sm:$0xff]  ;;  %v461_v43 = vld [vmem:[#allocation6 + $0x58] sm:$0xff]  ;;  %v899_v47 = vpack.c.bf16 %v605_v41, %v603_v40  ;;  %v458_v48 = vld [vmem:[#allocation6 + $0x40] sm:$0xff] }
  0x54   :  { %v608_v44 = vld [vmem:[#allocation7 + $0x48] sm:$0xff]  ;;  %v610_v45 = vld [vmem:[#allocation7 + $0x58] sm:$0xff]  ;;  %v460_v49 = vld [vmem:[#allocation6 + $0x50] sm:$0xff]  ;;  %v837_v50 = vpack.c.bf16 %v461_v43, %v459_v42 }
  0x55   :  { %v901_v51 = vpack.c.bf16 %v610_v45, %v608_v44  ;;  %v607_v52 = vld [vmem:[#allocation7 + $0x40] sm:$0xff]  ;;  %v609_v53 = vld [vmem:[#allocation7 + $0x50] sm:$0xff]  ;;  %v463_v54 = vld [vmem:[#allocation6 + $0x68] sm:$0xff]  ;;  %v839_v58 = vpack.c.bf16 %v460_v49, %v458_v48 }
  0x56   :  { %811 = vmatmul.mubr.msk.f32.vlgmr.msra.gmra.mrb[0].mxu0 %vm262_vm4, %v91_v33  ;;  %814 = vmatmul.mubr.msk.f32.vlgmr.msra.gmra.mrb[0].mxu1 %vm262_vm4, %v91_v33  ;;  %v465_v55 = vld [vmem:[#allocation6 + $0x78] sm:$0xff]  ;;  %v612_v56 = vld [vmem:[#allocation7 + $0x68] sm:$0xff]  ;;  %v903_v59 = vpack.c.bf16 %v609_v53, %v607_v52  ;;  %v462_v60 = vld [vmem:[#allocation6 + $0x60] sm:$0xff] }
  0x57   :  { %832 = vmatpush1.bf16.msra.mxu0 %v831_v34  ;;  %896 = vmatpush1.bf16.msra.mxu1 %v895_v35  ;;  %v614_v57 = vld [vmem:[#allocation7 + $0x78] sm:$0xff]  ;;  %v464_v61 = vld [vmem:[#allocation6 + $0x70] sm:$0xff]  ;;  %v841_v62 = vpack.c.bf16 %v465_v55, %v463_v54  ;;  %v611_v0 = vld [vmem:[#allocation7 + $0x60] sm:$0xff] }
  0x58   :  { %834 = vmatprep.subr.bf16.mxu0 %v833_v38  ;;  %898 = vmatprep.subr.bf16.mxu1 %v897_v39  ;;  %v905_v63 = vpack.c.bf16 %v614_v57, %v612_v56  ;;  %v613_v1 = vld [vmem:[#allocation7 + $0x70] sm:$0xff]  ;;  %v467_v2 = vld [vmem:[#allocation6 + $0x88] sm:$0xff]  ;;  %v469_v3 = vld [vmem:[#allocation6 + $0x98] sm:$0xff]  ;;  %v843_v6 = vpack.c.bf16 %v464_v61, %v462_v60 }
  0x59   :  { %v616_v4 = vld [vmem:[#allocation7 + $0x88] sm:$0xff]  ;;  %v618_v5 = vld [vmem:[#allocation7 + $0x98] sm:$0xff]  ;;  %v907_v7 = vpack.c.bf16 %v613_v1, %v611_v0  ;;  %v466_v8 = vld [vmem:[#allocation6 + $0x80] sm:$0xff]  ;;  %v845_v10 = vpack.c.bf16 %v469_v3, %v467_v2 }
  0x5a   :  { %v468_v9 = vld [vmem:[#allocation6 + $0x90] sm:$0xff]  ;;  %v909_v11 = vpack.c.bf16 %v618_v5, %v616_v4  ;;  %v615_v12 = vld [vmem:[#allocation7 + $0x80] sm:$0xff]  ;;  %v471_v14 = vld [vmem:[#allocation6 + $0xa8] sm:$0xff] }
  0x5b   :  { %836 = vmatpush1.bf16.msra.mxu0 %v835_v46  ;;  %900 = vmatpush1.bf16.msra.mxu1 %v899_v47  ;;  %v617_v13 = vld [vmem:[#allocation7 + $0x90] sm:$0xff]  ;;  %v473_v15 = vld [vmem:[#allocation6 + $0xb8] sm:$0xff]  ;;  %v620_v16 = vld [vmem:[#allocation7 + $0xa8] sm:$0xff]  ;;  %v847_v18 = vpack.c.bf16 %v468_v9, %v466_v8 }
  0x5c   :  { %838 = vmatprep.subr.bf16.mxu0 %v837_v50  ;;  %902 = vmatprep.subr.bf16.mxu1 %v901_v51  ;;  %v622_v17 = vld [vmem:[#allocation7 + $0xb8] sm:$0xff]  ;;  %v911_v19 = vpack.c.bf16 %v617_v13, %v615_v12  ;;  %v470_v20 = vld [vmem:[#allocation6 + $0xa0] sm:$0xff]  ;;  %v472_v21 = vld [vmem:[#allocation6 + $0xb0] sm:$0xff]  ;;  %v849_v22 = vpack.c.bf16 %v473_v15, %v471_v14 }
  0x5d   :  { %v913_v23 = vpack.c.bf16 %v622_v17, %v620_v16  ;;  %v619_v24 = vld [vmem:[#allocation7 + $0xa0] sm:$0xff]  ;;  %v621_v25 = vld [vmem:[#allocation7 + $0xb0] sm:$0xff]  ;;  %v475_v26 = vld [vmem:[#allocation6 + $0xc8] sm:$0xff]  ;;  %v851_v30 = vpack.c.bf16 %v472_v21, %v470_v20 }
  0x5e   :  { %v477_v27 = vld [vmem:[#allocation6 + $0xd8] sm:$0xff]  ;;  %v624_v28 = vld [vmem:[#allocation7 + $0xc8] sm:$0xff]  ;;  %v915_v31 = vpack.c.bf16 %v621_v25, %v619_v24  ;;  %v474_v32 = vld [vmem:[#allocation6 + $0xc0] sm:$0xff] }
  0x5f   :  { %840 = vmatpush1.bf16.msra.mxu0 %v839_v58  ;;  %904 = vmatpush1.bf16.msra.mxu1 %v903_v59  ;;  %v626_v29 = vld [vmem:[#allocation7 + $0xd8] sm:$0xff]  ;;  %v476_v33 = vld [vmem:[#allocation6 + $0xd0] sm:$0xff]  ;;  %v853_v34 = vpack.c.bf16 %v477_v27, %v475_v26  ;;  %v623_v36 = vld [vmem:[#allocation7 + $0xc0] sm:$0xff] }
  0x60   :  { %842 = vmatprep.subr.bf16.mxu0 %v841_v62  ;;  %906 = vmatprep.subr.bf16.mxu1 %v905_v63  ;;  %v917_v35 = vpack.c.bf16 %v626_v29, %v624_v28  ;;  %v625_v37 = vld [vmem:[#allocation7 + $0xd0] sm:$0xff]  ;;  %v479_v38 = vld [vmem:[#allocation6 + $0xe8] sm:$0xff]  ;;  %v481_v39 = vld [vmem:[#allocation6 + $0xf8] sm:$0xff]  ;;  %v855_v42 = vpack.c.bf16 %v476_v33, %v474_v32 }
  0x61   :  { %v628_v40 = vld [vmem:[#allocation7 + $0xe8] sm:$0xff]  ;;  %v630_v41 = vld [vmem:[#allocation7 + $0xf8] sm:$0xff]  ;;  %v919_v43 = vpack.c.bf16 %v625_v37, %v623_v36  ;;  %v478_v44 = vld [vmem:[#allocation6 + $0xe0] sm:$0xff]  ;;  %v857_v46 = vpack.c.bf16 %v481_v39, %v479_v38 }
  0x62   :  { %v480_v45 = vld [vmem:[#allocation6 + $0xf0] sm:$0xff]  ;;  %v921_v47 = vpack.c.bf16 %v630_v41, %v628_v40  ;;  %v627_v48 = vld [vmem:[#allocation7 + $0xe0] sm:$0xff]  ;;  %v483_v50 = vld [vmem:[#allocation6 + $0x108] sm:$0xff] }
  0x63   :  { %844 = vmatpush1.bf16.msra.mxu0 %v843_v6  ;;  %908 = vmatpush1.bf16.msra.mxu1 %v907_v7  ;;  %v629_v49 = vld [vmem:[#allocation7 + $0xf0] sm:$0xff]  ;;  %v485_v51 = vld [vmem:[#allocation6 + $0x118] sm:$0xff]  ;;  %v632_v52 = vld [vmem:[#allocation7 + $0x108] sm:$0xff]  ;;  %v859_v54 = vpack.c.bf16 %v480_v45, %v478_v44 }
  0x64   :  { %846 = vmatprep.subr.bf16.mxu0 %v845_v10  ;;  %910 = vmatprep.subr.bf16.mxu1 %v909_v11  ;;  %v634_v53 = vld [vmem:[#allocation7 + $0x118] sm:$0xff]  ;;  %v923_v55 = vpack.c.bf16 %v629_v49, %v627_v48  ;;  %v482_v56 = vld [vmem:[#allocation6 + $0x100] sm:$0xff]  ;;  %v484_v57 = vld [vmem:[#allocation6 + $0x110] sm:$0xff]  ;;  %v861_v58 = vpack.c.bf16 %v485_v51, %v483_v50 }
  0x65   :  { %v925_v59 = vpack.c.bf16 %v634_v53, %v632_v52  ;;  %v631_v60 = vld [vmem:[#allocation7 + $0x100] sm:$0xff]  ;;  %v633_v61 = vld [vmem:[#allocation7 + $0x110] sm:$0xff]  ;;  %v487_v62 = vld [vmem:[#allocation6 + $0x128] sm:$0xff]  ;;  %v863_v2 = vpack.c.bf16 %v484_v57, %v482_v56 }
  0x66   :  { %v489_v63 = vld [vmem:[#allocation6 + $0x138] sm:$0xff]  ;;  %v636_v0 = vld [vmem:[#allocation7 + $0x128] sm:$0xff]  ;;  %v927_v3 = vpack.c.bf16 %v633_v61, %v631_v60  ;;  %v486_v4 = vld [vmem:[#allocation6 + $0x120] sm:$0xff] }
  0x67   :  { %848 = vmatpush1.bf16.msra.mxu0 %v847_v18  ;;  %912 = vmatpush1.bf16.msra.mxu1 %v911_v19  ;;  %v638_v1 = vld [vmem:[#allocation7 + $0x138] sm:$0xff]  ;;  %v488_v5 = vld [vmem:[#allocation6 + $0x130] sm:$0xff]  ;;  %v865_v6 = vpack.c.bf16 %v489_v63, %v487_v62  ;;  %v635_v8 = vld [vmem:[#allocation7 + $0x120] sm:$0xff] }
  0x68   :  { %850 = vmatprep.subr.bf16.mxu0 %v849_v22  ;;  %914 = vmatprep.subr.bf16.mxu1 %v913_v23  ;;  %v929_v7 = vpack.c.bf16 %v638_v1, %v636_v0  ;;  %v637_v9 = vld [vmem:[#allocation7 + $0x130] sm:$0xff]  ;;  %v491_v10 = vld [vmem:[#allocation6 + $0x148] sm:$0xff]  ;;  %v493_v11 = vld [vmem:[#allocation6 + $0x158] sm:$0xff]  ;;  %v867_v14 = vpack.c.bf16 %v488_v5, %v486_v4 }
  0x69   :  { %v640_v12 = vld [vmem:[#allocation7 + $0x148] sm:$0xff]  ;;  %v642_v13 = vld [vmem:[#allocation7 + $0x158] sm:$0xff]  ;;  %v931_v15 = vpack.c.bf16 %v637_v9, %v635_v8  ;;  %v490_v16 = vld [vmem:[#allocation6 + $0x140] sm:$0xff]  ;;  %v869_v18 = vpack.c.bf16 %v493_v11, %v491_v10 }
  0x6a   :  { %v492_v17 = vld [vmem:[#allocation6 + $0x150] sm:$0xff]  ;;  %v933_v19 = vpack.c.bf16 %v642_v13, %v640_v12  ;;  %v639_v20 = vld [vmem:[#allocation7 + $0x140] sm:$0xff]  ;;  %v495_v22 = vld [vmem:[#allocation6 + $0x168] sm:$0xff] }
  0x6b   :  { %852 = vmatpush1.bf16.msra.mxu0 %v851_v30  ;;  %916 = vmatpush1.bf16.msra.mxu1 %v915_v31  ;;  %v641_v21 = vld [vmem:[#allocation7 + $0x150] sm:$0xff]  ;;  %v497_v23 = vld [vmem:[#allocation6 + $0x178] sm:$0xff]  ;;  %v644_v24 = vld [vmem:[#allocation7 + $0x168] sm:$0xff]  ;;  %v871_v26 = vpack.c.bf16 %v492_v17, %v490_v16 }
  0x6c   :  { %854 = vmatprep.subr.bf16.mxu0 %v853_v34  ;;  %918 = vmatprep.subr.bf16.mxu1 %v917_v35  ;;  %v646_v25 = vld [vmem:[#allocation7 + $0x178] sm:$0xff]  ;;  %v935_v27 = vpack.c.bf16 %v641_v21, %v639_v20  ;;  %v494_v28 = vld [vmem:[#allocation6 + $0x160] sm:$0xff]  ;;  %v496_v29 = vld [vmem:[#allocation6 + $0x170] sm:$0xff]  ;;  %v873_v30 = vpack.c.bf16 %v497_v23, %v495_v22  ;;  %v422_v20 = vlaneseq }
  0x6d   :  { %v937_v31 = vpack.c.bf16 %v646_v25, %v644_v24  ;;  %v643_v32 = vld [vmem:[#allocation7 + $0x160] sm:$0xff]  ;;  %v645_v33 = vld [vmem:[#allocation7 + $0x170] sm:$0xff]  ;;  %v499_v34 = vld [vmem:[#allocation6 + $0x188] sm:$0xff]  ;;  %v875_v38 = vpack.c.bf16 %v496_v29, %v494_v28 }
  0x6e   :  { %v501_v35 = vld [vmem:[#allocation6 + $0x198] sm:$0xff]  ;;  %v648_v36 = vld [vmem:[#allocation7 + $0x188] sm:$0xff]  ;;  %v939_v39 = vpack.c.bf16 %v645_v33, %v643_v32  ;;  %v498_v40 = vld [vmem:[#allocation6 + $0x180] sm:$0xff]  ;;  %v423_v21 = vshrl.u32 %v422_v20, 7 }
  0x6f   :  { %856 = vmatpush1.bf16.msra.mxu0 %v855_v42  ;;  %920 = vmatpush1.bf16.msra.mxu1 %v919_v43  ;;  %v650_v37 = vld [vmem:[#allocation7 + $0x198] sm:$0xff]  ;;  %v500_v41 = vld [vmem:[#allocation6 + $0x190] sm:$0xff]  ;;  %v877_v42 = vpack.c.bf16 %v501_v35, %v499_v34  ;;  %v647_v44 = vld [vmem:[#allocation7 + $0x180] sm:$0xff] }
  0x70   :  { %858 = vmatprep.subr.bf16.mxu0 %v857_v46  ;;  %922 = vmatprep.subr.bf16.mxu1 %v921_v47  ;;  %v941_v43 = vpack.c.bf16 %v650_v37, %v648_v36  ;;  %v649_v45 = vld [vmem:[#allocation7 + $0x190] sm:$0xff]  ;;  %v503_v46 = vld [vmem:[#allocation6 + $0x1a8] sm:$0xff]  ;;  %v505_v47 = vld [vmem:[#allocation6 + $0x1b8] sm:$0xff]  ;;  %v879_v50 = vpack.c.bf16 %v500_v41, %v498_v40  ;;  %v424_v22 = vsub.s32 0, %v423_v21  ;;  %v432_v23 = vsub.s32 2, %v423_v21 }
  0x71   :  { %v652_v48 = vld [vmem:[#allocation7 + $0x1a8] sm:$0xff]  ;;  %v654_v49 = vld [vmem:[#allocation7 + $0x1b8] sm:$0xff]  ;;  %v943_v51 = vpack.c.bf16 %v649_v45, %v647_v44  ;;  %v502_v52 = vld [vmem:[#allocation6 + $0x1a0] sm:$0xff]  ;;  %v428_v25 = vsub.s32 1, %v423_v21 }
  0x72   :  { %v504_v53 = vld [vmem:[#allocation6 + $0x1b0] sm:$0xff]  ;;  %v651_v56 = vld [vmem:[#allocation7 + $0x1a0] sm:$0xff]  ;;  %v656_v60 = vld [vmem:[#allocation7 + $0x1c8] sm:$0xff] }
  0x73   :  { %860 = vmatpush1.bf16.msra.mxu0 %v859_v54  ;;  %924 = vmatpush1.bf16.msra.mxu1 %v923_v55  ;;  %v881_v54 = vpack.c.bf16 %v505_v47, %v503_v46  ;;  %v945_v55 = vpack.c.bf16 %v654_v49, %v652_v48  ;;  %v653_v57 = vld [vmem:[#allocation7 + $0x1b0] sm:$0xff]  ;;  %v658_v61 = vld [vmem:[#allocation7 + $0x1d8] sm:$0xff]  ;;  %v883_v62 = vpack.c.bf16 %v504_v53, %v502_v52  ;;  %v655_v4 = vld [vmem:[#allocation7 + $0x1c0] sm:$0xff] }
  0x74   :  { %862 = vmatprep.subr.bf16.mxu0 %v861_v58  ;;  %926 = vmatprep.subr.bf16.mxu1 %v925_v59  ;;  %v507_v58 = vld [vmem:[#allocation6 + $0x1c8] sm:$0xff]  ;;  %v509_v59 = vld [vmem:[#allocation6 + $0x1d8] sm:$0xff]  ;;  %v947_v63 = vpack.c.bf16 %v653_v57, %v651_v56  ;;  %v949_v1 = vpack.c.bf16 %v658_v61, %v656_v60  ;;  %v510_v13 = vld [vmem:[#allocation6 + $0x1e0] sm:$0xff] }
  0x75   :  { %v885_v0 = vpack.c.bf16 %v509_v59, %v507_v58  ;;  %v511_v8 = vld [vmem:[#allocation6 + $0x1e8] sm:$0xff]  ;;  %v513_v9 = vld [vmem:[#allocation6 + $0x1f8] sm:$0xff]  ;;  %v659_v17 = vld [vmem:[#allocation7 + $0x1e0] sm:$0xff] }
  0x76   :  { %v660_v10 = vld [vmem:[#allocation7 + $0x1e8] sm:$0xff]  ;;  %v889_v11 = vpack.c.bf16 %v513_v9, %v511_v8  ;;  %v662_v12 = vld [vmem:[#allocation7 + $0x1f8] sm:$0xff] }
  0x77   :  { %864 = vmatpush1.bf16.msra.mxu0 %v863_v2  ;;  %928 = vmatpush1.bf16.msra.mxu1 %v927_v3  ;;  %v506_v2 = vld [vmem:[#allocation6 + $0x1c0] sm:$0xff]  ;;  %v508_v3 = vld [vmem:[#allocation6 + $0x1d0] sm:$0xff]  ;;  %v420_v24 = vld [vmem:[%s1241_s4] sm:$0xf] }
  0x78   :  { %866 = vmatprep.subr.bf16.mxu0 %v865_v6  ;;  %930 = vmatprep.subr.bf16.mxu1 %v929_v7  ;;  %v887_v5 = vpack.c.bf16 %v508_v3, %v506_v2  ;;  %v657_v6 = vld [vmem:[#allocation7 + $0x1d0] sm:$0xff]  ;;  %v433_v28 = vrot.slane %v420_v24, %v432_v23  ;;  %v429_v29 = vrot.slane %v420_v24, %v428_v25  ;;  %v663_v44 = vld [vmem:[%s1245_s8] sm:$0x3] }
  0x79   :  { %v951_v7 = vpack.c.bf16 %v657_v6, %v655_v4  ;;  %v668_v46 = vrot.slane %v663_v44, %v424_v22  ;;  %v816_v47 = vld [vmem:[%s1246_s9 + $0x1] ss:$2 sm:$0x3]  ;;  %v672_v49 = vrot.slane %v663_v44, %v428_v25  ;;  %v815_v9 = vld [vmem:[%s1247_s10] ss:$0 sm:$0xff] }
  0x7a   :  { %v783_v61 = vrot.slane %v816_v47, %v428_v25 }
  0x7b   :  { %868 = vmatpush1.bf16.msra.mxu0 %v867_v14  ;;  %932 = vmatpush1.bf16.msra.mxu1 %v931_v15  ;;  %v512_v14 = vld [vmem:[#allocation6 + $0x1f0] sm:$0xff]  ;;  %v953_v15 = vpack.c.bf16 %v662_v12, %v660_v10 }
  0x7c   :  { %870 = vmatprep.subr.bf16.mxu0 %v869_v18  ;;  %934 = vmatprep.subr.bf16.mxu1 %v933_v19  ;;  %v891_v16 = vpack.c.bf16 %v512_v14, %v510_v13  ;;  %v661_v18 = vld [vmem:[#allocation7 + $0x1f0] sm:$0xff] }
  0x7d   :  { %v955_v19 = vpack.c.bf16 %v661_v18, %v659_v17 }
  0x7f   :  { %872 = vmatpush1.bf16.msra.mxu0 %v871_v26  ;;  %936 = vmatpush1.bf16.msra.mxu1 %v935_v27  ;;  %v436_v26 = vsub.s32 3, %v423_v21  ;;  %v425_v27 = vrot.slane %v420_v24, %v424_v22 }
  0x80   :  { %874 = vmatprep.subr.bf16.mxu0 %v873_v30  ;;  %938 = vmatprep.subr.bf16.mxu1 %v937_v31 }
  0x81   :  { %v437_v30 = vrot.slane %v420_v24, %v436_v26 }
  0x83   :  { %876 = vmatpush1.bf16.msra.mxu0 %v875_v38  ;;  %940 = vmatpush1.bf16.msra.mxu1 %v939_v39 }
  0x84   :  { %878 = vmatprep.subr.bf16.mxu0 %v877_v42  ;;  %942 = vmatprep.subr.bf16.mxu1 %v941_v43  ;;  %v514_v43 = vld [vmem:[%s1243_s6] sm:$0x3] }
  0x85   :  { %v519_v45 = vrot.slane %v514_v43, %v424_v22  ;;  %v523_v48 = vrot.slane %v514_v43, %v428_v25 }
  0x87   :  { %880 = vmatpush1.bf16.msra.mxu0 %v879_v50  ;;  %944 = vmatpush1.bf16.msra.mxu1 %v943_v51  ;;  %v748_v50 = vld [vmem:[%s1246_s9] ss:$2 sm:$0x3] }
  0x88   :  { %882 = vmatprep.subr.bf16.mxu0 %v881_v54  ;;  %946 = vmatprep.subr.bf16.mxu1 %v945_v55  ;;  %v779_v55 = vrot.slane %v816_v47, %v424_v22  ;;  %v753_v58 = vrot.slane %v748_v50, %v424_v22 }
  0x8b   :  { %884 = vmatpush1.bf16.msra.mxu0 %v883_v62  ;;  %948 = vmatpush1.bf16.msra.mxu1 %v947_v63  ;;  %v757_v62 = vrot.slane %v748_v50, %v428_v25 }
  0x8c   :  { %886 = vmatprep.subr.bf16.mxu0 %v885_v0  ;;  %950 = vmatprep.subr.bf16.mxu1 %v949_v1 }
  0x8f   :  { %888 = vmatpush1.bf16.msra.mxu0 %v887_v5  ;;  %952 = vmatpush1.bf16.msra.mxu1 %v951_v7 }
  0x90   :  { %890 = vmatprep.subr.bf16.mxu0 %v889_v11  ;;  %954 = vmatprep.subr.bf16.mxu1 %v953_v15 }
  0x93   :  { %892 = vmatpush1.bf16.msra.mxu0 %v891_v16  ;;  %956 = vmatpush1.bf16.msra.mxu1 %v955_v19 }
 0x129   :  { %v344_v31 = vpop.f32.mrb[0].mxu0  ;;  %v415_v32 = vpop.f32.mrb[0].mxu1 }
 0x12a   :  { %v442_v33 = vadd.f32 %v425_v27, %v344_v31  ;;  %v444_v34 = vadd.f32 %v433_v28, %v415_v32  ;;  %v346_v35 = vpop.f32.mrb[1].mxu0  ;;  %v417_v36 = vpop.f32.mrb[1].mxu1 }
 0x12b   :  { %v443_v37 = vadd.f32 %v429_v29, %v346_v35  ;;  %v445_v38 = vadd.f32 %v437_v30, %v417_v36 }
 0x12c   :  { %v446_v41 = vmax.f32 %v442_v33, 0.0  ;;  %v448_v42 = vmax.f32 %v444_v34, 0.0 }
 0x12d   :  { %v447_v39 = vmax.f32 %v443_v37, 0.0  ;;  %v449_v40 = vmax.f32 %v445_v38, 0.0 }
 0x12f   :  { %590 = vmatprep.mubr.f32.mxu0 %v447_v39  ;;  %739 = vmatprep.mubr.f32.mxu1 %v449_v40 }
 0x130   :  { %591 = vmatmul.mubr.f32.vlgmr.msra.gmra.mrb[2].mxu0 %v446_v41  ;;  %740 = vmatmul.mubr.f32.vlgmr.msra.gmra.mrb[2].mxu1 %v448_v42 }
 0x203   :  { %v592_v51 = vpop.f32.mrb[2].mxu0  ;;  %v741_v52 = vpop.f32.mrb[2].mxu1 }
 0x204   :  { %v593_v53 = vadd.f32 %v592_v51, %v519_v45  ;;  %v742_v54 = vadd.f32 %v741_v52, %v668_v46  ;;  %v594_v56 = vpop.f32.mrb[3].mxu0  ;;  %v743_v57 = vpop.f32.mrb[3].mxu1 }
 0x205   :  { %v595_v59 = vadd.f32 %v594_v56, %v523_v48  ;;  %v744_v60 = vadd.f32 %v743_v57, %v672_v49 }
 0x206   :  { %v597_v63 = vmax.f32 %v593_v53, 0.0  ;;  %v746_v0 = vmax.f32 %v742_v54, 0.0 }
 0x207   :  { %v598_v1 = vmax.f32 %v595_v59, 0.0  ;;  %v747_v2 = vmax.f32 %v744_v60, 0.0 }
 0x208   :  { %v786_v3 = vmul.f32 %v779_v55, %v746_v0  ;;  %v760_v4 = vmul.f32 %v753_v58, %v597_v63 }
 0x209   :  { %v787_v5 = vmul.f32 %v783_v61, %v747_v2  ;;  %v761_v6 = vmul.f32 %v757_v62, %v598_v1 }
 0x20b   :  { %v762_v7 = vadd.f32 %v761_v6, %v760_v4  ;;  %v788_v8 = vadd.f32 %v787_v5, %v786_v3 }
 0x20d   :  { %763 = vadd.xlane.f32.xlu0 %v762_v7 }
 0x211   :  { %789 = vadd.xlane.f32.xlu0 %v788_v8 }
 0x29a   :  { %v764_v10 = vpop.xlane.xlu0 %763 }
 0x29b   :  { %v772_v11 = vadd.f32 %v815_v9, %v764_v10 }
 0x29d   :  { %793 = vst.msk [vmem:[%s1248_s11] sm:$0xff] %vm792_vm5, %v772_v11 }
 0x29e   :  { %v790_v12 = vpop.xlane.xlu0 %789 }
 0x29f   :  { %v791_v13 = vadd.f32 %v815_v9, %v790_v12 }
 0x2a1   :  { %795 = vst.msk [vmem:[%s1248_s11] sm:$0xff] %vm794_vm6, %v791_v13 }
 0x2a2   :  { %800 = vsyncpa [#allocation3], 1 }
 0x2a3   :  { %801 = vsyncpa [#allocation5], 1 }
 0x2a4   :  { %802 = vsyncpa [#allocation8], 1 }

</bundles_post_ra>
